<compile_context>
chip_gen: v7x
topology: tpu7x:2x2x1
jax: 0.10.0
libtpu: 0.0.40
codegen_flags: <defaults>
</compile_context>

<pallas_src>
import functools

import jax
import jax.numpy as jnp
from jax.experimental import pallas as pl
from jax.experimental.pallas import tpu as pltpu

BN_EPS = 1e-5


def _round_up(x, m):
    return (x + m - 1) // m * m


@functools.lru_cache(maxsize=None)
def _vmem_capacity_bytes():
    try:
        return int(pltpu.get_tpu_info().vmem_capacity_bytes)
    except Exception:
        return 64 * 1024 * 1024                       # conservative (v7x-sized) fallback


@functools.lru_cache(maxsize=None)
def _roll_is_jnp_convention():
    """Probe pltpu.roll's rotation direction once (out[i] == x[i - shift], like jnp.roll?)."""
    def k(x_ref, o_ref):
        o_ref[...] = pltpu.roll(x_ref[...], shift=1, axis=1)

    x = jnp.arange(128, dtype=jnp.float32).reshape(1, 128)
    out = pl.pallas_call(k, out_shape=jax.ShapeDtypeStruct((1, 128), jnp.float32))(x)
    return bool(float(out[0, 1]) == 0.0)


def _pick_lane_tile(total, target):
    """Largest multiple-of-128 divisor of `total` (itself a multiple of 128) <= target."""
    q = total // 128
    best, d = 1, 1
    while d <= q:
        if q % d == 0 and 128 * d <= target:
            best = d
        d += 1
    return 128 * best


# ---------------------------------------------------------------------------
# Pass 1: fused conv (sum of per-tap, lane-rotated matmuls) + per-tile partial stats.
# ---------------------------------------------------------------------------
def _conv_stats_kernel(x_ref, w_ref, mask_ref, conv_ref, stats_ref, *, shifts):
    """x_ref: (Cin, TL) padded activations in per-image flat layout (lanes = n,h,w).
    w_ref: (KH*KW, Cout, Cin) per-tap weights.
    mask_ref: (1, TL) 1.0 on lanes that are real conv outputs, 0.0 on junk/pad lanes.
    conv_ref: (Cout, TL) conv output in the same flat layout (junk on masked-off lanes).
    stats_ref: (1, Cout, 2) per-tile partial [sum, sumsq] over masked lanes.
    """
    x = x_ref[...]
    acc = None
    for t, sft in enumerate(shifts):
        # (Cout, Cin) @ (Cin, TL) on the MXU; lane axis is dense (multiple of 128).
        contrib = jnp.dot(w_ref[t], x, preferred_element_type=jnp.float32)
        if sft:
            # acc[f] += contrib[f + delta]: pure lane rotation (XLU slot); circular wrap
            # only lands on junk lanes because tiles hold whole (padded) images.
            contrib = pltpu.roll(contrib, shift=sft, axis=1)
        acc = contrib if acc is None else acc + contrib

    # NOTE: conv bias intentionally omitted - exactly cancelled by the training-mode
    # BatchNorm mean subtraction that follows (variance unchanged).
    conv_ref[...] = acc

    am = acc * mask_ref[...]                           # zero junk lanes for the statistics
    stats_ref[:, :, 0:1] = jnp.sum(am, axis=1, keepdims=True)[None]
    stats_ref[:, :, 1:2] = jnp.sum(am * am, axis=1, keepdims=True)[None]


# ---------------------------------------------------------------------------
# Pass 2: BatchNorm (batch statistics, biased var) + ReLU, elementwise streaming.
# ---------------------------------------------------------------------------
def _bn_relu_kernel(conv_ref, stats_ref, gamma_ref, beta_ref, o_ref, *, inv_m):
    mean = stats_ref[:, 0:1] * inv_m                                    # (Cout, 1)
    var = jnp.maximum(stats_ref[:, 1:2] * inv_m - mean * mean, 0.0)     # biased variance
    scale = gamma_ref[...] * jax.lax.rsqrt(var + BN_EPS)                # (Cout, 1)
    shift = beta_ref[...] - mean * scale
    o_ref[...] = jnp.maximum(conv_ref[...] * scale + shift, 0.0).astype(o_ref.dtype)


# ---------------------------------------------------------------------------
# MaxPool2d with indices (PyTorch flat h*W+w convention), lane-dense flat tiles.
# ---------------------------------------------------------------------------
def _maxpool_kernel(win_ref, base_ref, v_ref, i_ref, *, offsets):
    # win_ref: (ph*pw, C, TL); base_ref: (1, TL) int32 window-origin flat index.
    base = base_ref[...]
    best_v = win_ref[0]
    best_i = jnp.broadcast_to(base + offsets[0], best_v.shape)
    for k in range(1, len(offsets)):
        cand = win_ref[k]
        idx = base + offsets[k]
        better = cand > best_v                  # strict ">" -> first max wins (torch-like)
        best_v = jnp.where(better, cand, best_v)
        best_i = jnp.where(better, idx, best_i)
    v_ref[...] = best_v
    i_ref[...] = best_i


# ---------------------------------------------------------------------------
# BlueLayer forward (channel-major in, channel-major out).
# ---------------------------------------------------------------------------
def blue_layer_forward_cm(x_cm, weight, gamma, beta, *, padding, stride, dilation=1,
                          tile_images=None, compute_dtype=jnp.bfloat16):
    """Conv2d (bias folded away) -> Dropout(p=0) -> BatchNorm2d(train) -> ReLU.

    x_cm: (Cin, N, H, W) channel-major; weight: (Cout, Cin, KH, KW) (PyTorch layout).
    Returns (Cout, N, Ho, Wo) channel-major.
    """
    Cin, N, H, W = x_cm.shape
    Cout, Cin_w, KH, KW = weight.shape
    assert Cin_w == Cin
    p, s, d = int(padding), int(stride), int(dilation)
    Hp, Wp = H + 2 * p, W + 2 * p
    Ho = (Hp - d * (KH - 1) - 1) // s + 1
    Wo = (Wp - d * (KW - 1) - 1) // s + 1
    hw = Hp * Wp
    Lp = _round_up(hw, 128)                           # per-image flat length (lane-dense)

    # Channel-major, spatially padded, per-image flattened (zeros in the Lp-hw tail).
    xp = jnp.pad(x_cm, ((0, 0), (0, 0), (p, p), (p, p)))
    xf = xp.reshape(Cin, N, hw)
    if Lp > hw:
        xf = jnp.pad(xf, ((0, 0), (0, 0), (0, Lp - hw)))

    # Pass-1 tiles must hold whole images (so roll wrap lands on junk lanes); size the tile
    # from the per-generation VMEM budget (v5e/v6e: 128 MiB, v7x: 64 MiB physical).
    cap = _vmem_capacity_bytes()
    budget = min(cap // 2, 48 * 1024 * 1024)
    itemsize = jnp.dtype(compute_dtype).itemsize
    bytes_per_image = Lp * (Cin * itemsize + 4 + Cout * 4) * 2        # double-buffered
    bn = max(1, min(N, budget // max(bytes_per_image, 1)))
    if tile_images is not None:
        bn = max(1, min(bn, int(tile_images)))
    N2 = _round_up(N, bn)
    if N2 > N:
        xf = jnp.pad(xf, ((0, 0), (0, N2 - N), (0, 0)))               # zero images: 0 stats
    Mflat = N2 * Lp
    xf = xf.reshape(Cin, Mflat).astype(compute_dtype)

    # Lanes holding a real conv output (h = ho*s, w = wo*s inside the padded grid).
    r = jnp.arange(Lp, dtype=jnp.int32)
    hh, ww = r // Wp, r % Wp
    ok = ((r < hw) & (hh % s == 0) & (hh // s < Ho) & (ww % s == 0) & (ww // s < Wo))
    mask = jnp.tile(ok.astype(jnp.float32), N2).reshape(1, Mflat)

    w_taps = jnp.transpose(weight, (2, 3, 0, 1)).reshape(KH * KW, Cout, Cin)
    w_taps = w_taps.astype(compute_dtype)

    TL1 = bn * Lp
    n_tiles = N2 // bn
    vmem_limit = int(min(cap * 3 // 4, 112 * 1024 * 1024))

    # Per-tap flat-layout lane shift (stride>1 computes the stride-1 conv and subsamples).
    jnp_conv = _roll_is_jnp_convention()
    shifts = []
    for kh in range(KH):
        for kw in range(KW):
            delta = (kh * d * Wp + kw * d) % TL1
            shifts.append(0 if delta == 0 else ((TL1 - delta) if jnp_conv else delta))
    shifts = tuple(shifts)

    # --- pass 1: fused conv + per-tile partial stats (fully "parallel" -> megacore) ------
    conv, stats_p = pl.pallas_call(
        functools.partial(_conv_stats_kernel, shifts=shifts),
        grid=(n_tiles,),
        in_specs=[pl.BlockSpec((Cin, TL1), lambda i: (0, i)),
                  pl.BlockSpec((KH * KW, Cout, Cin), lambda i: (0, 0, 0)),
                  pl.BlockSpec((1, TL1), lambda i: (0, i))],
        out_specs=(pl.BlockSpec((Cout, TL1), lambda i: (0, i)),
                   pl.BlockSpec((1, Cout, 2), lambda i: (i, 0, 0))),
        out_shape=(jax.ShapeDtypeStruct((Cout, Mflat), jnp.float32),
                   jax.ShapeDtypeStruct((n_tiles, Cout, 2), jnp.float32)),
        compiler_params=pltpu.CompilerParams(
            dimension_semantics=("parallel",),
            vmem_limit_bytes=vmem_limit),
        cost_estimate=pl.CostEstimate(
            flops=2 * Cout * Cin * KH * KW * Mflat, transcendentals=0,
            bytes_accessed=(itemsize * Cin * Mflat + 4 * Mflat + 4 * Cout * Mflat
                            + 4 * n_tiles * Cout * 2)),
    )(xf, w_taps, mask)

    stats = jnp.sum(stats_p, axis=0)                                   # (Cout, 2), tiny
    m_true = N * Ho * Wo
    # NOTE: one-pass E[x^2]-E[x]^2 variance in f32 (see review correctness concern); fine
    # at these sizes, switch to centered partials for very large M.

    # --- pass 2: BN + ReLU, large streaming tiles, in place over the conv intermediate ---
    tl2_target = max(128, min(32768, budget // (16 * Cout)))
    TL2 = _pick_lane_tile(Mflat, tl2_target)
    out_flat = pl.pallas_call(
        functools.partial(_bn_relu_kernel, inv_m=1.0 / float(m_true)),
        grid=(Mflat // TL2,),
        in_specs=[pl.BlockSpec((Cout, TL2), lambda i: (0, i)),
                  pl.BlockSpec((Cout, 2), lambda i: (0, 0)),
                  pl.BlockSpec((Cout, 1), lambda i: (0, 0)),
                  pl.BlockSpec((Cout, 1), lambda i: (0, 0))],
        out_specs=pl.BlockSpec((Cout, TL2), lambda i: (0, i)),
        out_shape=jax.ShapeDtypeStruct((Cout, Mflat), jnp.float32),
        input_output_aliases={0: 0},                   # reuse the conv HBM buffer in place
        compiler_params=pltpu.CompilerParams(
            dimension_semantics=("parallel",),
            vmem_limit_bytes=vmem_limit),
        cost_estimate=pl.CostEstimate(
            flops=3 * Cout * Mflat, transcendentals=Cout,
            bytes_accessed=4 * 2 * Cout * Mflat),
    )(conv, stats,
      gamma.reshape(Cout, 1).astype(jnp.float32),
      beta.reshape(Cout, 1).astype(jnp.float32))

    # Extract the valid output lanes -> channel-major (Cout, N, Ho, Wo).
    of = out_flat[:, :N * Lp].reshape(Cout, N, Lp)[:, :, :hw].reshape(Cout, N, Hp, Wp)
    of = jax.lax.slice(of, (0, 0, 0, 0),
                       (Cout, N, (Ho - 1) * s + 1, (Wo - 1) * s + 1),
                       (1, 1, s, s))
    return of


# ---------------------------------------------------------------------------
# MaxPool2d with indices, channel-major, lane-dense flat output.
# ---------------------------------------------------------------------------
def max_pool2d_with_indices_cm(x_cm, kernel_size, stride=None):
    """nn.MaxPool2d(kernel_size, stride, return_indices=True) on (C, N, H, W) input."""
    if isinstance(kernel_size, (tuple, list)):
        ph, pw = int(kernel_size[0]), int(kernel_size[1])
    else:
        ph = pw = int(kernel_size)
    if stride is None:
        sh, sw = ph, pw
    elif isinstance(stride, (tuple, list)):
        sh, sw = int(stride[0]), int(stride[1])
    else:
        sh = sw = int(stride)

    C, N, H, W = x_cm.shape
    Po = (H - ph) // sh + 1
    Qo = (W - pw) // sw + 1
    M = N * Po * Qo
    Mp = _round_up(M, 128)

    # Window slab (ph*pw, C, N*Po*Qo): lane-dense flat minor dim, many images per tile.
    wins = []
    for dh in range(ph):
        for dw in range(pw):
            wins.append(jax.lax.slice(
                x_cm, (0, 0, dh, dw),
                (C, N, dh + (Po - 1) * sh + 1, dw + (Qo - 1) * sw + 1),
                (1, 1, sh, sw)))                                        # (C, N, Po, Qo)
    win = jnp.stack(wins, axis=0).reshape(ph * pw, C, M)
    if Mp > M:
        win = jnp.pad(win, ((0, 0), (0, 0), (0, Mp - M)))

    # Torch flat h*W+w index of each window's origin (independent of n and c).
    po = jnp.arange(Po, dtype=jnp.int32)[:, None]
    qo = jnp.arange(Qo, dtype=jnp.int32)[None, :]
    base = (po * sh * W + qo * sw).reshape(-1)
    base = jnp.tile(base, N).reshape(1, M)
    if Mp > M:
        base = jnp.pad(base, ((0, 0), (0, Mp - M)))

    offsets = tuple(dh * W + dw for dh in range(ph) for dw in range(pw))

    cap = _vmem_capacity_bytes()
    budget = min(cap // 2, 48 * 1024 * 1024)
    tl_target = max(128, min(32768, budget // (8 * (ph * pw * C + 3 * C + 1))))
    TL = _pick_lane_tile(Mp, tl_target)
    vmem_limit = int(min(cap * 3 // 4, 112 * 1024 * 1024))

    vals, idx = pl.pallas_call(
        functools.partial(_maxpool_kernel, offsets=offsets),
        grid=(Mp // TL,),
        in_specs=[pl.BlockSpec((ph * pw, C, TL), lambda i: (0, 0, i)),
                  pl.BlockSpec((1, TL), lambda i: (0, i))],
        out_specs=(pl.BlockSpec((C, TL), lambda i: (0, i)),
                   pl.BlockSpec((C, TL), lambda i: (0, i))),
        out_shape=(jax.ShapeDtypeStruct((C, Mp), x_cm.dtype),
                   jax.ShapeDtypeStruct((C, Mp), jnp.int32)),
        compiler_params=pltpu.CompilerParams(
            dimension_semantics=("parallel",),
            vmem_limit_bytes=vmem_limit),
    )(win, base)

    vals = vals[:, :M].reshape(C, N, Po, Qo)
    idx = idx[:, :M].reshape(C, N, Po, Qo)
    return vals, idx


# ---------------------------------------------------------------------------
# EncoderBlock forward.
# ---------------------------------------------------------------------------
def encoder_block_forward(x, layer_weights, layer_gammas, layer_betas, *,
                          padding, stride, mpool_dim, dropout=0.0,
                          tile_images=None, compute_dtype=jnp.bfloat16):
    """EncoderBlock.forward: BlueLayer stack then MaxPool2d(return_indices=True).

    Returns (pooled, indices, upsample_size) like the PyTorch module.
    `dropout` is accepted for signature parity; p=0 (identity) is what is implemented.
    """
    x_cm = jnp.transpose(x, (1, 0, 2, 3))        # single NCHW -> channel-major transpose
    for w, g, b in zip(layer_weights, layer_gammas, layer_betas):
        x_cm = blue_layer_forward_cm(x_cm, w, g, b, padding=padding, stride=stride,
                                     tile_images=tile_images, compute_dtype=compute_dtype)
    C, N, H, W = x_cm.shape
    upsample_size = (N, C, H, W)                 # torch.Size analogue
    pooled_cm, idx_cm = max_pool2d_with_indices_cm(x_cm, *mpool_dim)
    pooled = jnp.transpose(pooled_cm, (1, 0, 2, 3))     # tiny pooled tensors only
    indices = jnp.transpose(idx_cm, (1, 0, 2, 3))
    return pooled, indices, upsample_size


# ---------------------------------------------------------------------------
# Pure-JAX reference (mirrors the PyTorch module, including the conv bias).
# ---------------------------------------------------------------------------
def reference_encoder(x, weights, biases, gammas, betas, *, padding, stride):
    for w, b, g, bt in zip(weights, biases, gammas, betas):
        y = jax.lax.conv_general_dilated(
            x, w, window_strides=(stride, stride),
            padding=[(padding, padding), (padding, padding)],
            dimension_numbers=("NCHW", "OIHW", "NCHW"),
            precision=jax.lax.Precision.HIGHEST)
        y = y + b[None, :, None, None]                     # bias kept here (kernel drops it)
        mean = jnp.mean(y, axis=(0, 2, 3), keepdims=True)
        var = jnp.mean((y - mean) ** 2, axis=(0, 2, 3), keepdims=True)
        y = (y - mean) * jax.lax.rsqrt(var + BN_EPS)
        y = y * g[None, :, None, None] + bt[None, :, None, None]
        x = jnp.maximum(y, 0.0)
    return x


def reference_maxpool(x, mpool_dim):
    if len(mpool_dim) == 1:
        ph = pw = sh = sw = int(mpool_dim[0])
    else:
        ph = pw = int(mpool_dim[0])
        sh = sw = int(mpool_dim[1])
    N, C, H, W = x.shape
    Ho = (H - ph) // sh + 1
    Wo = (W - pw) // sw + 1
    wins = []
    for kh in range(ph):
        for kw in range(pw):
            wins.append(jax.lax.slice(
                x, (0, 0, kh, kw),
                (N, C, kh + (Ho - 1) * sh + 1, kw + (Wo - 1) * sw + 1),
                (1, 1, sh, sw)))
    stack = jnp.stack(wins, axis=0)                        # (ph*pw, N, C, Ho, Wo)
    pooled = jnp.max(stack, axis=0)
    kbest = jnp.argmax(stack, axis=0)                      # first max on ties
    kh_b, kw_b = kbest // pw, kbest % pw
    oh = jnp.arange(Ho, dtype=jnp.int32)[None, None, :, None]
    ow = jnp.arange(Wo, dtype=jnp.int32)[None, None, None, :]
    indices = (oh * sh + kh_b) * W + (ow * sw + kw_b)
    return pooled, indices.astype(jnp.int32)


if __name__ == "__main__":
    # EncoderBlock(in_size=4, out_size=8, n_layers=3, kernel_size=3, padding=1, stride=1,
    #              mpool_dim=(2,), dropout=0.0) applied to x of shape (2, 4, 16, 16).
    in_size, out_size, n_layers = 4, 8, 3
    kernel_size, padding, stride = 3, 1, 1
    mpool_dim = (2,)
    dropout = 0.0

    key = jax.random.PRNGKey(0)
    x_key, *layer_keys = jax.random.split(key, 1 + n_layers)
    x = jax.random.normal(x_key, (2, in_size, 16, 16), dtype=jnp.float32)

    weights, biases, gammas, betas = [], [], [], []
    c_in = in_size
    for lk in layer_keys:
        k_w, k_b, k_g, k_bt = jax.random.split(lk, 4)
        weights.append(0.1 * jax.random.normal(
            k_w, (out_size, c_in, kernel_size, kernel_size), dtype=jnp.float32))
        biases.append(0.1 * jax.random.normal(k_b, (out_size,), dtype=jnp.float32))  # ref only
        gammas.append(1.0 + 0.1 * jax.random.normal(k_g, (out_size,), dtype=jnp.float32))
        betas.append(0.1 * jax.random.normal(k_bt, (out_size,), dtype=jnp.float32))
        c_in = out_size

    # tile_images=1 -> a 2-step pass-1 grid (exercises the partial-stats reduction path);
    # compute_dtype=f32 keeps the strict tolerance check (bf16 is the production default,
    # halving pass-1 input DMA on v5e/v6e/v7x).
    pooled, indices, upsample_size = encoder_block_forward(
        x, weights, gammas, betas,
        padding=padding, stride=stride, mpool_dim=mpool_dim, dropout=dropout,
        tile_images=1, compute_dtype=jnp.float32)
    pooled = jax.block_until_ready(pooled)
    indices = jax.block_until_ready(indices)

    # Reference (includes the conv bias -> also validates the bias-cancellation optimization).
    ref_feat = reference_encoder(x, weights, biases, gammas, betas,
                                 padding=padding, stride=stride)
    ref_pooled, ref_indices = reference_maxpool(ref_feat, mpool_dim)

    N, C, H, W = ref_feat.shape
    assert upsample_size == (N, C, H, W) == (2, out_size, 16, 16)
    assert pooled.shape == ref_pooled.shape == (2, out_size, 8, 8)
    assert indices.shape == (2, out_size, 8, 8) and indices.dtype == jnp.int32

    err = float(jnp.max(jnp.abs(pooled - ref_pooled)))
    assert err < 5e-4, f"pooled values mismatch vs reference: {err}"

    # Indices must point at the pooled maxima (PyTorch flat h*W+w convention).
    flat = ref_feat.reshape(N, C, H * W)
    gathered = jnp.take_along_axis(flat, indices.reshape(N, C, -1), axis=2).reshape(pooled.shape)
    gerr = float(jnp.max(jnp.abs(gathered - pooled)))
    assert gerr < 5e-4, f"indices do not point at the pooled maxima: {gerr}"
    agree = float(jnp.mean((indices == ref_indices).astype(jnp.float32)))
    assert agree >= 0.99, f"max-pool indices disagree with reference too often: {agree}"

    print("KERNEL_OK")
</pallas_src>

<mosaic_0001>
module attributes {stable_mosaic.version = 11 : i64} {
  func.func @k(%arg0: memref<1x128xf32, #tpu.memory_space<vmem>>, %arg1: memref<1x128xf32, #tpu.memory_space<vmem>>) attributes {dimension_semantics = [], scalar_prefetch = 0 : i64, scratch_operands = 0 : i64, tpu.core_type = #tpu.core_type<tc>} {
    %c0 = arith.constant 0 : index
    %c0_0 = arith.constant 0 : index
    %0 = vector.load %arg0[%c0, %c0_0] : memref<1x128xf32, #tpu.memory_space<vmem>>, vector<1x128xf32>
    %c1_i32 = arith.constant 1 : i32
    %1 = tpu.dynamic_rotate %0 by %c1_i32 dim 1 : vector<1x128xf32>, i32 -> vector<1x128xf32>
    %c0_1 = arith.constant 0 : index
    %c0_2 = arith.constant 0 : index
    %2 = vector.load %arg1[%c0_1, %c0_2] : memref<1x128xf32, #tpu.memory_space<vmem>>, vector<1x128xf32>
    tpu.vector_store %arg1[%c0_1, %c0_2], %1 {strides = array<i32>} : memref<1x128xf32, #tpu.memory_space<vmem>>, vector<1x128xf32>,
    return
  }
}

</mosaic_0001>

<bundles_post_ra>
// kernel: tpu_custom_call.1
= control target key start
LH: loop header
LB: loop body
LE: loop exit
PB: predicated region body
PF: predicated region fallthrough
CT: control target
= control target key end

     0   :  { %6 = vsyncpa [#allocation3], 0  ;;  %s128_s0 = inlined_call_operand.hbm [shape: f32[1,128], index: 0, kind: input, shape index: {}]   ;;  %s129_s1 = inlined_call_operand.hbm [shape: f32[1,128], index: 1, kind: output, shape index: {}]  }
   0x1   :  { %7 = vsyncpa [#allocation4], 0  ;;  %s91_s6 = smov [#allocation2]   ;;  %s43_s10 = scalar_lea.hbm %s128_s0, 16 }
   0x2   :  { %s14_s7 = sshll.u32 %s91_s6, 4  ;;  %p44_p0 = scmp.ne.s32.totalorder %s128_s0, %s43_s10  ;;  %s15_s7 = int_to_ptr.vmem [resolvable:$true] %s14_s7 }
   0x3   :  { %p47_p1 = scmp.lt.u32.totalorder %s43_s10, %s128_s0 }
   0x5   :  { %p49_p2 = pnand %p47_p1, %p44_p0 }
   0x7   :  { %52 = shalt.err (!%p49_p2)
}
   0x8   :  { %s53_s15 = scalar_lea.vmem %s15_s7, 16  ;;  %s57_s16 = scalar_lea.vmem %s15_s7, 32 }
   0x9   :  { %p54_p3 = scmp.ne.s32.totalorder %s15_s7, %s53_s15  ;;  %p58_p4 = scmp.lt.s32.totalorder %s15_s7, %s15_s7 }
   0xa   :  { %p59_p5 = scmp.lt.s32.totalorder %s57_s16, %s53_s15 }
   0xc   :  { %p60_p6 = por %p59_p5, %p58_p4 }
   0xe   :  { %p61_p7 = pnand %p60_p6, %p54_p3 }
  0x10   :  { %64 = shalt.err (!%p61_p7)
}
  0x11   :  { %17 = dma.hbm_to_vmem [thread:$0]  %s128_s0, 16, %s15_s7, [#allocation3]  }
  0x12   :  { %87 = dma.done.wait [#allocation3], 16  }
  0x13   :  { %88 = vsyncadd [#allocation3], 4294967280  ;;  %v21_v0 = vld [vmem:[#allocation2] sm:$0x1]  ;;  %s92_s19 = smov 1   ;;  %s93_s20 = smov [#allocation5]  }
  0x14   :  { %22 = vrot.lane.b32.xlu0 %v21_v0, %s92_s19  ;;  %s31_s21 = sshll.u32 %s93_s20, 4  ;;  %s32_s21 = int_to_ptr.vmem [resolvable:$true] %s31_s21 }
  0x15   :  { %s65_s22 = scalar_lea.vmem %s32_s21, 16  ;;  %s69_s23 = scalar_lea.vmem %s32_s21, 32 }
  0x16   :  { %p66_p8 = scmp.ne.s32.totalorder %s32_s21, %s65_s22  ;;  %p70_p9 = scmp.lt.s32.totalorder %s32_s21, %s32_s21 }
  0x17   :  { %p71_p10 = scmp.lt.s32.totalorder %s69_s23, %s65_s22 }
  0x19   :  { %p72_p11 = por %p71_p10, %p70_p9 }
  0x1b   :  { %p73_p12 = pnand %p72_p11, %p66_p8 }
  0x86   :  { %v23_v1 = vpop.permute.xlu0 %22 }
  0x87   :  { %24 = vst [vmem:[#allocation5] sm:$0x1] %v23_v1 }
  0x88   :  { %76 = shalt.err (!%p73_p12)
}
  0x89   :  { %s77_s25 = scalar_lea.hbm %s129_s1, 16 }
  0x8a   :  { %p78_p13 = scmp.ne.s32.totalorder %s129_s1, %s77_s25  ;;  %p81_p0 = scmp.lt.u32.totalorder %s77_s25, %s129_s1 }
  0x8c   :  { %p83_p1 = pnand %p81_p0, %p78_p13 }
  0x8e   :  { %86 = shalt.err (!%p83_p1)
}
  0x8f   :  { %34 = dma.vmem_to_hbm [thread:$0]  %s32_s21, 16, %s129_s1, [#allocation4]  }
  0x90   :  { %89 = dma.done.wait [#allocation4], 16  }
  0x91   :  { %90 = vsyncadd [#allocation4], 4294967280 }
  0x92   :  { %38 = vsyncpa [#allocation3], 1 }
  0x93   :  { %39 = vsyncpa [#allocation4], 1 }

</bundles_post_ra>
